<compile_context>
chip_gen: v6e
topology: v6e:2x2x1
jax: 0.10.0
libtpu: 0.0.40
codegen_flags: <defaults>
</compile_context>

<pallas_src>
import functools

import jax
import jax.numpy as jnp
from jax.experimental import pallas as pl
from jax.experimental.pallas import tpu as pltpu


def dummy_model_kernel(ids_ref, emb_hbm, wT_ref, b_ref, out_ref, buf_ref, sems,
                       *, TB, S, inv_S):
    """One grid step = one tile of TB batch rows.

    ids_ref : (B_pad*S,) int32 SMEM scalar prefetch (gather addresses)
    emb_hbm : (V, E) f32 ref in HBM (memory_space=pl.ANY) -- never fully loaded
    wT_ref  : (E, Lp) f32 resident VMEM tile -- linear weight, transposed + lane-padded
    b_ref   : (1, Lp) f32 resident VMEM tile -- bias, padded lanes = -1e30
    out_ref : (1, TB, Lp) f32 -- softmax probs for this batch tile (lane-dense)
    buf_ref : (TB*S, E) f32 VMEM scratch -- gathered embedding rows, seq-major
    sems    : (TB*S,) DMA semaphores -- one per concurrent row gather
    """
    t = pl.program_id(0)

    # 1) Launch all TB*S embedding-row gathers concurrently (HBM -> VMEM), then
    #    wait once.  Overlapping the tiny 64 B DMAs hides their round-trip latency.
    copies = []
    for i in range(TB):
        for s in range(S):
            idx = ids_ref[(t * TB + i) * S + s]          # dynamic SMEM scalar read
            k = s * TB + i                               # seq-major destination row
            cp = pltpu.make_async_copy(
                emb_hbm.at[pl.ds(idx, 1)],               # (1, E) source row
                buf_ref.at[pl.ds(k, 1)],                 # (1, E) destination row
                sems.at[k])
            cp.start()
            copies.append(cp)
    for cp in copies:
        cp.wait()

    # 2) Mean-pool over the sequence: S contiguous (TB, E) slab adds on the VPU.
    acc = buf_ref[pl.ds(0, TB), :]
    for s in range(1, S):
        acc = acc + buf_ref[pl.ds(s * TB, TB), :]
    pooled = acc * jnp.float32(inv_S)                    # (TB, E)

    # TODO(synk): dropout (p=0.1) is inference-mode identity here.

    # 3) Linear + softmax once per tile; lane-dense Lp=128 output.  Padded label
    #    lanes have weight 0 and bias -1e30, so exp() underflows to exactly 0 and
    #    the softmax normalization matches the L real labels.
    logits = jnp.dot(pooled, wT_ref[...],
                     preferred_element_type=jnp.float32) + b_ref[...]
    m = jnp.max(logits, axis=1, keepdims=True)
    e = jnp.exp(logits - m)
    probs = e * pl.reciprocal(jnp.sum(e, axis=1, keepdims=True))  # exact path
    out_ref[0] = probs


def dummy_model_forward(input_ids, emb_table, weight, bias):
    """input_ids (B, S) int; emb_table (V, E) f32;
    weight (L, E) f32 (PyTorch nn.Linear layout); bias (L,) f32 -> (B, L) f32."""
    B, S = input_ids.shape
    V, E = emb_table.shape
    L = weight.shape[0]
    Lp = ((L + 127) // 128) * 128                        # lane-dense label width

    # Batch tile size: >= 2 tiles whenever B >= 2 (v7x megacore), capped at 8 rows.
    TB = min(8, max(1, B // 2))
    num_tiles = -(-B // TB)
    B_pad = num_tiles * TB

    # ids become SMEM scalars driving the gather; clamp so the row DMA never reads
    # outside the table.  Pad batch rows with id 0 (results discarded by the slice).
    ids = jnp.clip(input_ids.astype(jnp.int32), 0, V - 1)
    if B_pad != B:
        ids = jnp.concatenate(
            [ids, jnp.zeros((B_pad - B, S), jnp.int32)], axis=0)
    ids_flat = ids.reshape(B_pad * S)

    # Lane-pad the linear params once in the wrapper (layout plumbing, not compute):
    # padded weight columns are 0, padded bias lanes are -1e30 (=> prob 0 in-kernel).
    wT = jnp.zeros((E, Lp), jnp.float32).at[:, :L].set(weight.T.astype(jnp.float32))
    b2d = jnp.full((1, Lp), -1e30, jnp.float32).at[0, :L].set(bias.astype(jnp.float32))

    grid_spec = pltpu.PrefetchScalarGridSpec(
        num_scalar_prefetch=1,
        grid=(num_tiles,),
        in_specs=[
            # Embedding table stays in HBM; rows are gathered by manual DMA.
            pl.BlockSpec(memory_space=pl.ANY),
            # Constant index maps -> resident tiles across the whole grid.
            pl.BlockSpec((E, Lp), lambda t, ids: (0, 0)),
            pl.BlockSpec((1, Lp), lambda t, ids: (0, 0)),
        ],
        out_specs=pl.BlockSpec((1, TB, Lp), lambda t, ids: (t, 0, 0)),
        scratch_shapes=[
            pltpu.VMEM((TB * S, E), jnp.float32),
            pltpu.SemaphoreType.DMA((TB * S,)),
        ],
    )

    out3 = pl.pallas_call(
        functools.partial(dummy_model_kernel, TB=TB, S=S, inv_S=1.0 / S),
        out_shape=jax.ShapeDtypeStruct((num_tiles, TB, Lp), jnp.float32),
        grid_spec=grid_spec,
        compiler_params=pltpu.CompilerParams(
            dimension_semantics=("parallel",)),
    )(ids_flat, emb_table.astype(jnp.float32), wT, b2d)

    return out3.reshape(B_pad, Lp)[:B, :L]


if __name__ == "__main__":
    # Small, self-consistent shapes: in_features == embedding dim == 16.
    B, S = 2, 8
    V = 1024          # toy stand-in for vocab_size=250000; the kernel design is
                      # vocab-size independent (table never enters VMEM)
    E = 16            # nn.Embedding(vocab_size, 16)
    L = 10            # num_labels

    key = jax.random.PRNGKey(0)
    k_ids, k_emb, k_w, k_b = jax.random.split(key, 4)

    input_ids = jax.random.randint(k_ids, (B, S), 0, V, dtype=jnp.int32)
    emb_table = jax.random.normal(k_emb, (V, E), dtype=jnp.float32)
    # PyTorch-style Linear init (uniform +-1/sqrt(in_features)), deterministic.
    bound = 1.0 / jnp.sqrt(jnp.float32(E))
    weight = jax.random.uniform(k_w, (L, E), jnp.float32, -bound, bound)
    bias = jax.random.uniform(k_b, (L,), jnp.float32, -bound, bound)

    out = dummy_model_forward(input_ids, emb_table, weight, bias)
    out = jax.block_until_ready(out)

    # Pure-JAX reference check.
    ref_pooled = jnp.take(emb_table, input_ids, axis=0).mean(axis=1)
    ref_logits = ref_pooled @ weight.T + bias
    ref = jax.nn.softmax(ref_logits, axis=1)
    assert out.shape == (B, L)
    assert jnp.allclose(out, ref, atol=1e-5), "mismatch vs reference"

    print("KERNEL_OK")
</pallas_src>

<mosaic_0001>
module attributes {stable_mosaic.version = 11 : i64} {
  func.func @dummy_model_kernel(%arg0: i32, %arg1: memref<16xi32, #tpu.memory_space<smem>>, %arg2: memref<1024x16xf32, #tpu.memory_space<any>>, %arg3: memref<16x128xf32, #tpu.memory_space<vmem>>, %arg4: memref<1x128xf32, #tpu.memory_space<vmem>>, %arg5: memref<1x1x128xf32, #tpu.memory_space<vmem>>, %arg6: memref<8x16xf32, #tpu.memory_space<vmem>>, %arg7: memref<8x!tpu.dma_semaphore, #tpu.memory_space<semaphore_mem>>) attributes {dimension_semantics = [#tpu.dimension_semantics<parallel>], iteration_bounds = array<i64: 2>, scalar_prefetch = 1 : i64, scratch_operands = 2 : i64, tpu.core_type = #tpu.core_type<tc>, window_params = [{}, {pipeline_mode = #tpu.pipeline_mode<synchronous>, transform_indices = @transform_1, window_bounds = array<i64: 16, 128>}, {pipeline_mode = #tpu.pipeline_mode<synchronous>, transform_indices = @transform_2, window_bounds = array<i64: 1, 128>}, {transform_indices = @transform_3, window_bounds = array<i64: 1, 1, 128>}]} {
    %c1_i32 = arith.constant 1 : i32
    %0 = arith.muli %arg0, %c1_i32 : i32
    %c0_i32 = arith.constant 0 : i32
    %1 = arith.addi %0, %c0_i32 : i32
    %c8_i32 = arith.constant 8 : i32
    %2 = arith.muli %1, %c8_i32 : i32
    %c0_i32_0 = arith.constant 0 : i32
    %3 = arith.addi %2, %c0_i32_0 : i32
    %4 = arith.index_cast %3 : i32 to index
    %5 = memref.load %arg1[%4] : memref<16xi32, #tpu.memory_space<smem>>
    %c0_i32_1 = arith.constant 0 : i32
    %c0_i32_2 = arith.constant 0 : i32
    %6 = tpu.memref_slice %arg2[%5, %c0_i32_2] : memref<1024x16xf32, #tpu.memory_space<any>> -> memref<1x16xf32, #tpu.memory_space<any>>
    %c0_i32_3 = arith.constant 0 : i32
    %c0_i32_4 = arith.constant 0 : i32
    %7 = tpu.memref_slice %arg6[%c0_i32_3, %c0_i32_4] : memref<8x16xf32, #tpu.memory_space<vmem>> -> memref<1x16xf32, #tpu.memory_space<vmem>>
    %8 = tpu.memref_slice %arg7[%c0_i32_1] : memref<8x!tpu.dma_semaphore, #tpu.memory_space<semaphore_mem>> -> memref<1x!tpu.dma_semaphore, #tpu.memory_space<semaphore_mem>>
    %9 = tpu.memref_squeeze %8 : memref<1x!tpu.dma_semaphore, #tpu.memory_space<semaphore_mem>> -> memref<!tpu.dma_semaphore, #tpu.memory_space<semaphore_mem>>
    tpu.enqueue_dma source(%6 : memref<1x16xf32, #tpu.memory_space<any>>) target(%7 : memref<1x16xf32, #tpu.memory_space<vmem>>) target_semaphore(%9 : memref<!tpu.dma_semaphore, #tpu.memory_space<semaphore_mem>>)
    %c1_i32_5 = arith.constant 1 : i32
    %10 = arith.muli %arg0, %c1_i32_5 : i32
    %c0_i32_6 = arith.constant 0 : i32
    %11 = arith.addi %10, %c0_i32_6 : i32
    %c8_i32_7 = arith.constant 8 : i32
    %12 = arith.muli %11, %c8_i32_7 : i32
    %c1_i32_8 = arith.constant 1 : i32
    %13 = arith.addi %12, %c1_i32_8 : i32
    %14 = arith.index_cast %13 : i32 to index
    %15 = memref.load %arg1[%14] : memref<16xi32, #tpu.memory_space<smem>>
    %c1_i32_9 = arith.constant 1 : i32
    %c0_i32_10 = arith.constant 0 : i32
    %16 = tpu.memref_slice %arg2[%15, %c0_i32_10] : memref<1024x16xf32, #tpu.memory_space<any>> -> memref<1x16xf32, #tpu.memory_space<any>>
    %c1_i32_11 = arith.constant 1 : i32
    %c0_i32_12 = arith.constant 0 : i32
    %17 = tpu.memref_slice %arg6[%c1_i32_11, %c0_i32_12] : memref<8x16xf32, #tpu.memory_space<vmem>> -> memref<1x16xf32, #tpu.memory_space<vmem>>
    %18 = tpu.memref_slice %arg7[%c1_i32_9] : memref<8x!tpu.dma_semaphore, #tpu.memory_space<semaphore_mem>> -> memref<1x!tpu.dma_semaphore, #tpu.memory_space<semaphore_mem>>
    %19 = tpu.memref_squeeze %18 : memref<1x!tpu.dma_semaphore, #tpu.memory_space<semaphore_mem>> -> memref<!tpu.dma_semaphore, #tpu.memory_space<semaphore_mem>>
    tpu.enqueue_dma source(%16 : memref<1x16xf32, #tpu.memory_space<any>>) target(%17 : memref<1x16xf32, #tpu.memory_space<vmem>>) target_semaphore(%19 : memref<!tpu.dma_semaphore, #tpu.memory_space<semaphore_mem>>)
    %c1_i32_13 = arith.constant 1 : i32
    %20 = arith.muli %arg0, %c1_i32_13 : i32
    %c0_i32_14 = arith.constant 0 : i32
    %21 = arith.addi %20, %c0_i32_14 : i32
    %c8_i32_15 = arith.constant 8 : i32
    %22 = arith.muli %21, %c8_i32_15 : i32
    %c2_i32 = arith.constant 2 : i32
    %23 = arith.addi %22, %c2_i32 : i32
    %24 = arith.index_cast %23 : i32 to index
    %25 = memref.load %arg1[%24] : memref<16xi32, #tpu.memory_space<smem>>
    %c2_i32_16 = arith.constant 2 : i32
    %c0_i32_17 = arith.constant 0 : i32
    %26 = tpu.memref_slice %arg2[%25, %c0_i32_17] : memref<1024x16xf32, #tpu.memory_space<any>> -> memref<1x16xf32, #tpu.memory_space<any>>
    %c2_i32_18 = arith.constant 2 : i32
    %c0_i32_19 = arith.constant 0 : i32
    %27 = tpu.memref_slice %arg6[%c2_i32_18, %c0_i32_19] : memref<8x16xf32, #tpu.memory_space<vmem>> -> memref<1x16xf32, #tpu.memory_space<vmem>>
    %28 = tpu.memref_slice %arg7[%c2_i32_16] : memref<8x!tpu.dma_semaphore, #tpu.memory_space<semaphore_mem>> -> memref<1x!tpu.dma_semaphore, #tpu.memory_space<semaphore_mem>>
    %29 = tpu.memref_squeeze %28 : memref<1x!tpu.dma_semaphore, #tpu.memory_space<semaphore_mem>> -> memref<!tpu.dma_semaphore, #tpu.memory_space<semaphore_mem>>
    tpu.enqueue_dma source(%26 : memref<1x16xf32, #tpu.memory_space<any>>) target(%27 : memref<1x16xf32, #tpu.memory_space<vmem>>) target_semaphore(%29 : memref<!tpu.dma_semaphore, #tpu.memory_space<semaphore_mem>>)
    %c1_i32_20 = arith.constant 1 : i32
    %30 = arith.muli %arg0, %c1_i32_20 : i32
    %c0_i32_21 = arith.constant 0 : i32
    %31 = arith.addi %30, %c0_i32_21 : i32
    %c8_i32_22 = arith.constant 8 : i32
    %32 = arith.muli %31, %c8_i32_22 : i32
    %c3_i32 = arith.constant 3 : i32
    %33 = arith.addi %32, %c3_i32 : i32
    %34 = arith.index_cast %33 : i32 to index
    %35 = memref.load %arg1[%34] : memref<16xi32, #tpu.memory_space<smem>>
    %c3_i32_23 = arith.constant 3 : i32
    %c0_i32_24 = arith.constant 0 : i32
    %36 = tpu.memref_slice %arg2[%35, %c0_i32_24] : memref<1024x16xf32, #tpu.memory_space<any>> -> memref<1x16xf32, #tpu.memory_space<any>>
    %c3_i32_25 = arith.constant 3 : i32
    %c0_i32_26 = arith.constant 0 : i32
    %37 = tpu.memref_slice %arg6[%c3_i32_25, %c0_i32_26] : memref<8x16xf32, #tpu.memory_space<vmem>> -> memref<1x16xf32, #tpu.memory_space<vmem>>
    %38 = tpu.memref_slice %arg7[%c3_i32_23] : memref<8x!tpu.dma_semaphore, #tpu.memory_space<semaphore_mem>> -> memref<1x!tpu.dma_semaphore, #tpu.memory_space<semaphore_mem>>
    %39 = tpu.memref_squeeze %38 : memref<1x!tpu.dma_semaphore, #tpu.memory_space<semaphore_mem>> -> memref<!tpu.dma_semaphore, #tpu.memory_space<semaphore_mem>>
    tpu.enqueue_dma source(%36 : memref<1x16xf32, #tpu.memory_space<any>>) target(%37 : memref<1x16xf32, #tpu.memory_space<vmem>>) target_semaphore(%39 : memref<!tpu.dma_semaphore, #tpu.memory_space<semaphore_mem>>)
    %c1_i32_27 = arith.constant 1 : i32
    %40 = arith.muli %arg0, %c1_i32_27 : i32
    %c0_i32_28 = arith.constant 0 : i32
    %41 = arith.addi %40, %c0_i32_28 : i32
    %c8_i32_29 = arith.constant 8 : i32
    %42 = arith.muli %41, %c8_i32_29 : i32
    %c4_i32 = arith.constant 4 : i32
    %43 = arith.addi %42, %c4_i32 : i32
    %44 = arith.index_cast %43 : i32 to index
    %45 = memref.load %arg1[%44] : memref<16xi32, #tpu.memory_space<smem>>
    %c4_i32_30 = arith.constant 4 : i32
    %c0_i32_31 = arith.constant 0 : i32
    %46 = tpu.memref_slice %arg2[%45, %c0_i32_31] : memref<1024x16xf32, #tpu.memory_space<any>> -> memref<1x16xf32, #tpu.memory_space<any>>
    %c4_i32_32 = arith.constant 4 : i32
    %c0_i32_33 = arith.constant 0 : i32
    %47 = tpu.memref_slice %arg6[%c4_i32_32, %c0_i32_33] : memref<8x16xf32, #tpu.memory_space<vmem>> -> memref<1x16xf32, #tpu.memory_space<vmem>>
    %48 = tpu.memref_slice %arg7[%c4_i32_30] : memref<8x!tpu.dma_semaphore, #tpu.memory_space<semaphore_mem>> -> memref<1x!tpu.dma_semaphore, #tpu.memory_space<semaphore_mem>>
    %49 = tpu.memref_squeeze %48 : memref<1x!tpu.dma_semaphore, #tpu.memory_space<semaphore_mem>> -> memref<!tpu.dma_semaphore, #tpu.memory_space<semaphore_mem>>
    tpu.enqueue_dma source(%46 : memref<1x16xf32, #tpu.memory_space<any>>) target(%47 : memref<1x16xf32, #tpu.memory_space<vmem>>) target_semaphore(%49 : memref<!tpu.dma_semaphore, #tpu.memory_space<semaphore_mem>>)
    %c1_i32_34 = arith.constant 1 : i32
    %50 = arith.muli %arg0, %c1_i32_34 : i32
    %c0_i32_35 = arith.constant 0 : i32
    %51 = arith.addi %50, %c0_i32_35 : i32
    %c8_i32_36 = arith.constant 8 : i32
    %52 = arith.muli %51, %c8_i32_36 : i32
    %c5_i32 = arith.constant 5 : i32
    %53 = arith.addi %52, %c5_i32 : i32
    %54 = arith.index_cast %53 : i32 to index
    %55 = memref.load %arg1[%54] : memref<16xi32, #tpu.memory_space<smem>>
    %c5_i32_37 = arith.constant 5 : i32
    %c0_i32_38 = arith.constant 0 : i32
    %56 = tpu.memref_slice %arg2[%55, %c0_i32_38] : memref<1024x16xf32, #tpu.memory_space<any>> -> memref<1x16xf32, #tpu.memory_space<any>>
    %c5_i32_39 = arith.constant 5 : i32
    %c0_i32_40 = arith.constant 0 : i32
    %57 = tpu.memref_slice %arg6[%c5_i32_39, %c0_i32_40] : memref<8x16xf32, #tpu.memory_space<vmem>> -> memref<1x16xf32, #tpu.memory_space<vmem>>
    %58 = tpu.memref_slice %arg7[%c5_i32_37] : memref<8x!tpu.dma_semaphore, #tpu.memory_space<semaphore_mem>> -> memref<1x!tpu.dma_semaphore, #tpu.memory_space<semaphore_mem>>
    %59 = tpu.memref_squeeze %58 : memref<1x!tpu.dma_semaphore, #tpu.memory_space<semaphore_mem>> -> memref<!tpu.dma_semaphore, #tpu.memory_space<semaphore_mem>>
    tpu.enqueue_dma source(%56 : memref<1x16xf32, #tpu.memory_space<any>>) target(%57 : memref<1x16xf32, #tpu.memory_space<vmem>>) target_semaphore(%59 : memref<!tpu.dma_semaphore, #tpu.memory_space<semaphore_mem>>)
    %c1_i32_41 = arith.constant 1 : i32
    %60 = arith.muli %arg0, %c1_i32_41 : i32
    %c0_i32_42 = arith.constant 0 : i32
    %61 = arith.addi %60, %c0_i32_42 : i32
    %c8_i32_43 = arith.constant 8 : i32
    %62 = arith.muli %61, %c8_i32_43 : i32
    %c6_i32 = arith.constant 6 : i32
    %63 = arith.addi %62, %c6_i32 : i32
    %64 = arith.index_cast %63 : i32 to index
    %65 = memref.load %arg1[%64] : memref<16xi32, #tpu.memory_space<smem>>
    %c6_i32_44 = arith.constant 6 : i32
    %c0_i32_45 = arith.constant 0 : i32
    %66 = tpu.memref_slice %arg2[%65, %c0_i32_45] : memref<1024x16xf32, #tpu.memory_space<any>> -> memref<1x16xf32, #tpu.memory_space<any>>
    %c6_i32_46 = arith.constant 6 : i32
    %c0_i32_47 = arith.constant 0 : i32
    %67 = tpu.memref_slice %arg6[%c6_i32_46, %c0_i32_47] : memref<8x16xf32, #tpu.memory_space<vmem>> -> memref<1x16xf32, #tpu.memory_space<vmem>>
    %68 = tpu.memref_slice %arg7[%c6_i32_44] : memref<8x!tpu.dma_semaphore, #tpu.memory_space<semaphore_mem>> -> memref<1x!tpu.dma_semaphore, #tpu.memory_space<semaphore_mem>>
    %69 = tpu.memref_squeeze %68 : memref<1x!tpu.dma_semaphore, #tpu.memory_space<semaphore_mem>> -> memref<!tpu.dma_semaphore, #tpu.memory_space<semaphore_mem>>
    tpu.enqueue_dma source(%66 : memref<1x16xf32, #tpu.memory_space<any>>) target(%67 : memref<1x16xf32, #tpu.memory_space<vmem>>) target_semaphore(%69 : memref<!tpu.dma_semaphore, #tpu.memory_space<semaphore_mem>>)
    %c1_i32_48 = arith.constant 1 : i32
    %70 = arith.muli %arg0, %c1_i32_48 : i32
    %c0_i32_49 = arith.constant 0 : i32
    %71 = arith.addi %70, %c0_i32_49 : i32
    %c8_i32_50 = arith.constant 8 : i32
    %72 = arith.muli %71, %c8_i32_50 : i32
    %c7_i32 = arith.constant 7 : i32
    %73 = arith.addi %72, %c7_i32 : i32
    %74 = arith.index_cast %73 : i32 to index
    %75 = memref.load %arg1[%74] : memref<16xi32, #tpu.memory_space<smem>>
    %c7_i32_51 = arith.constant 7 : i32
    %c0_i32_52 = arith.constant 0 : i32
    %76 = tpu.memref_slice %arg2[%75, %c0_i32_52] : memref<1024x16xf32, #tpu.memory_space<any>> -> memref<1x16xf32, #tpu.memory_space<any>>
    %c7_i32_53 = arith.constant 7 : i32
    %c0_i32_54 = arith.constant 0 : i32
    %77 = tpu.memref_slice %arg6[%c7_i32_53, %c0_i32_54] : memref<8x16xf32, #tpu.memory_space<vmem>> -> memref<1x16xf32, #tpu.memory_space<vmem>>
    %78 = tpu.memref_slice %arg7[%c7_i32_51] : memref<8x!tpu.dma_semaphore, #tpu.memory_space<semaphore_mem>> -> memref<1x!tpu.dma_semaphore, #tpu.memory_space<semaphore_mem>>
    %79 = tpu.memref_squeeze %78 : memref<1x!tpu.dma_semaphore, #tpu.memory_space<semaphore_mem>> -> memref<!tpu.dma_semaphore, #tpu.memory_space<semaphore_mem>>
    tpu.enqueue_dma source(%76 : memref<1x16xf32, #tpu.memory_space<any>>) target(%77 : memref<1x16xf32, #tpu.memory_space<vmem>>) target_semaphore(%79 : memref<!tpu.dma_semaphore, #tpu.memory_space<semaphore_mem>>)
    %c0_i32_55 = arith.constant 0 : i32
    %c0_i32_56 = arith.constant 0 : i32
    %80 = tpu.memref_slice %arg2[%5, %c0_i32_56] : memref<1024x16xf32, #tpu.memory_space<any>> -> memref<1x16xf32, #tpu.memory_space<any>>
    %c0_i32_57 = arith.constant 0 : i32
    %c0_i32_58 = arith.constant 0 : i32
    %81 = tpu.memref_slice %arg6[%c0_i32_57, %c0_i32_58] : memref<8x16xf32, #tpu.memory_space<vmem>> -> memref<1x16xf32, #tpu.memory_space<vmem>>
    %82 = tpu.memref_slice %arg7[%c0_i32_55] : memref<8x!tpu.dma_semaphore, #tpu.memory_space<semaphore_mem>> -> memref<1x!tpu.dma_semaphore, #tpu.memory_space<semaphore_mem>>
    %83 = tpu.memref_squeeze %82 : memref<1x!tpu.dma_semaphore, #tpu.memory_space<semaphore_mem>> -> memref<!tpu.dma_semaphore, #tpu.memory_space<semaphore_mem>>
    tpu.wait_dma2 semaphore(%83 : memref<!tpu.dma_semaphore, #tpu.memory_space<semaphore_mem>>) src(%80 : memref<1x16xf32, #tpu.memory_space<any>>) dst(%81 : memref<1x16xf32, #tpu.memory_space<vmem>>)
    %c1_i32_59 = arith.constant 1 : i32
    %c0_i32_60 = arith.constant 0 : i32
    %84 = tpu.memref_slice %arg2[%15, %c0_i32_60] : memref<1024x16xf32, #tpu.memory_space<any>> -> memref<1x16xf32, #tpu.memory_space<any>>
    %c1_i32_61 = arith.constant 1 : i32
    %c0_i32_62 = arith.constant 0 : i32
    %85 = tpu.memref_slice %arg6[%c1_i32_61, %c0_i32_62] : memref<8x16xf32, #tpu.memory_space<vmem>> -> memref<1x16xf32, #tpu.memory_space<vmem>>
    %86 = tpu.memref_slice %arg7[%c1_i32_59] : memref<8x!tpu.dma_semaphore, #tpu.memory_space<semaphore_mem>> -> memref<1x!tpu.dma_semaphore, #tpu.memory_space<semaphore_mem>>
    %87 = tpu.memref_squeeze %86 : memref<1x!tpu.dma_semaphore, #tpu.memory_space<semaphore_mem>> -> memref<!tpu.dma_semaphore, #tpu.memory_space<semaphore_mem>>
    tpu.wait_dma2 semaphore(%87 : memref<!tpu.dma_semaphore, #tpu.memory_space<semaphore_mem>>) src(%84 : memref<1x16xf32, #tpu.memory_space<any>>) dst(%85 : memref<1x16xf32, #tpu.memory_space<vmem>>)
    %c2_i32_63 = arith.constant 2 : i32
    %c0_i32_64 = arith.constant 0 : i32
    %88 = tpu.memref_slice %arg2[%25, %c0_i32_64] : memref<1024x16xf32, #tpu.memory_space<any>> -> memref<1x16xf32, #tpu.memory_space<any>>
    %c2_i32_65 = arith.constant 2 : i32
    %c0_i32_66 = arith.constant 0 : i32
    %89 = tpu.memref_slice %arg6[%c2_i32_65, %c0_i32_66] : memref<8x16xf32, #tpu.memory_space<vmem>> -> memref<1x16xf32, #tpu.memory_space<vmem>>
    %90 = tpu.memref_slice %arg7[%c2_i32_63] : memref<8x!tpu.dma_semaphore, #tpu.memory_space<semaphore_mem>> -> memref<1x!tpu.dma_semaphore, #tpu.memory_space<semaphore_mem>>
    %91 = tpu.memref_squeeze %90 : memref<1x!tpu.dma_semaphore, #tpu.memory_space<semaphore_mem>> -> memref<!tpu.dma_semaphore, #tpu.memory_space<semaphore_mem>>
    tpu.wait_dma2 semaphore(%91 : memref<!tpu.dma_semaphore, #tpu.memory_space<semaphore_mem>>) src(%88 : memref<1x16xf32, #tpu.memory_space<any>>) dst(%89 : memref<1x16xf32, #tpu.memory_space<vmem>>)
    %c3_i32_67 = arith.constant 3 : i32
    %c0_i32_68 = arith.constant 0 : i32
    %92 = tpu.memref_slice %arg2[%35, %c0_i32_68] : memref<1024x16xf32, #tpu.memory_space<any>> -> memref<1x16xf32, #tpu.memory_space<any>>
    %c3_i32_69 = arith.constant 3 : i32
    %c0_i32_70 = arith.constant 0 : i32
    %93 = tpu.memref_slice %arg6[%c3_i32_69, %c0_i32_70] : memref<8x16xf32, #tpu.memory_space<vmem>> -> memref<1x16xf32, #tpu.memory_space<vmem>>
    %94 = tpu.memref_slice %arg7[%c3_i32_67] : memref<8x!tpu.dma_semaphore, #tpu.memory_space<semaphore_mem>> -> memref<1x!tpu.dma_semaphore, #tpu.memory_space<semaphore_mem>>
    %95 = tpu.memref_squeeze %94 : memref<1x!tpu.dma_semaphore, #tpu.memory_space<semaphore_mem>> -> memref<!tpu.dma_semaphore, #tpu.memory_space<semaphore_mem>>
    tpu.wait_dma2 semaphore(%95 : memref<!tpu.dma_semaphore, #tpu.memory_space<semaphore_mem>>) src(%92 : memref<1x16xf32, #tpu.memory_space<any>>) dst(%93 : memref<1x16xf32, #tpu.memory_space<vmem>>)
    %c4_i32_71 = arith.constant 4 : i32
    %c0_i32_72 = arith.constant 0 : i32
    %96 = tpu.memref_slice %arg2[%45, %c0_i32_72] : memref<1024x16xf32, #tpu.memory_space<any>> -> memref<1x16xf32, #tpu.memory_space<any>>
    %c4_i32_73 = arith.constant 4 : i32
    %c0_i32_74 = arith.constant 0 : i32
    %97 = tpu.memref_slice %arg6[%c4_i32_73, %c0_i32_74] : memref<8x16xf32, #tpu.memory_space<vmem>> -> memref<1x16xf32, #tpu.memory_space<vmem>>
    %98 = tpu.memref_slice %arg7[%c4_i32_71] : memref<8x!tpu.dma_semaphore, #tpu.memory_space<semaphore_mem>> -> memref<1x!tpu.dma_semaphore, #tpu.memory_space<semaphore_mem>>
    %99 = tpu.memref_squeeze %98 : memref<1x!tpu.dma_semaphore, #tpu.memory_space<semaphore_mem>> -> memref<!tpu.dma_semaphore, #tpu.memory_space<semaphore_mem>>
    tpu.wait_dma2 semaphore(%99 : memref<!tpu.dma_semaphore, #tpu.memory_space<semaphore_mem>>) src(%96 : memref<1x16xf32, #tpu.memory_space<any>>) dst(%97 : memref<1x16xf32, #tpu.memory_space<vmem>>)
    %c5_i32_75 = arith.constant 5 : i32
    %c0_i32_76 = arith.constant 0 : i32
    %100 = tpu.memref_slice %arg2[%55, %c0_i32_76] : memref<1024x16xf32, #tpu.memory_space<any>> -> memref<1x16xf32, #tpu.memory_space<any>>
    %c5_i32_77 = arith.constant 5 : i32
    %c0_i32_78 = arith.constant 0 : i32
    %101 = tpu.memref_slice %arg6[%c5_i32_77, %c0_i32_78] : memref<8x16xf32, #tpu.memory_space<vmem>> -> memref<1x16xf32, #tpu.memory_space<vmem>>
    %102 = tpu.memref_slice %arg7[%c5_i32_75] : memref<8x!tpu.dma_semaphore, #tpu.memory_space<semaphore_mem>> -> memref<1x!tpu.dma_semaphore, #tpu.memory_space<semaphore_mem>>
    %103 = tpu.memref_squeeze %102 : memref<1x!tpu.dma_semaphore, #tpu.memory_space<semaphore_mem>> -> memref<!tpu.dma_semaphore, #tpu.memory_space<semaphore_mem>>
    tpu.wait_dma2 semaphore(%103 : memref<!tpu.dma_semaphore, #tpu.memory_space<semaphore_mem>>) src(%100 : memref<1x16xf32, #tpu.memory_space<any>>) dst(%101 : memref<1x16xf32, #tpu.memory_space<vmem>>)
    %c6_i32_79 = arith.constant 6 : i32
    %c0_i32_80 = arith.constant 0 : i32
    %104 = tpu.memref_slice %arg2[%65, %c0_i32_80] : memref<1024x16xf32, #tpu.memory_space<any>> -> memref<1x16xf32, #tpu.memory_space<any>>
    %c6_i32_81 = arith.constant 6 : i32
    %c0_i32_82 = arith.constant 0 : i32
    %105 = tpu.memref_slice %arg6[%c6_i32_81, %c0_i32_82] : memref<8x16xf32, #tpu.memory_space<vmem>> -> memref<1x16xf32, #tpu.memory_space<vmem>>
    %106 = tpu.memref_slice %arg7[%c6_i32_79] : memref<8x!tpu.dma_semaphore, #tpu.memory_space<semaphore_mem>> -> memref<1x!tpu.dma_semaphore, #tpu.memory_space<semaphore_mem>>
    %107 = tpu.memref_squeeze %106 : memref<1x!tpu.dma_semaphore, #tpu.memory_space<semaphore_mem>> -> memref<!tpu.dma_semaphore, #tpu.memory_space<semaphore_mem>>
    tpu.wait_dma2 semaphore(%107 : memref<!tpu.dma_semaphore, #tpu.memory_space<semaphore_mem>>) src(%104 : memref<1x16xf32, #tpu.memory_space<any>>) dst(%105 : memref<1x16xf32, #tpu.memory_space<vmem>>)
    %c7_i32_83 = arith.constant 7 : i32
    %c0_i32_84 = arith.constant 0 : i32
    %108 = tpu.memref_slice %arg2[%75, %c0_i32_84] : memref<1024x16xf32, #tpu.memory_space<any>> -> memref<1x16xf32, #tpu.memory_space<any>>
    %c7_i32_85 = arith.constant 7 : i32
    %c0_i32_86 = arith.constant 0 : i32
    %109 = tpu.memref_slice %arg6[%c7_i32_85, %c0_i32_86] : memref<8x16xf32, #tpu.memory_space<vmem>> -> memref<1x16xf32, #tpu.memory_space<vmem>>
    %110 = tpu.memref_slice %arg7[%c7_i32_83] : memref<8x!tpu.dma_semaphore, #tpu.memory_space<semaphore_mem>> -> memref<1x!tpu.dma_semaphore, #tpu.memory_space<semaphore_mem>>
    %111 = tpu.memref_squeeze %110 : memref<1x!tpu.dma_semaphore, #tpu.memory_space<semaphore_mem>> -> memref<!tpu.dma_semaphore, #tpu.memory_space<semaphore_mem>>
    tpu.wait_dma2 semaphore(%111 : memref<!tpu.dma_semaphore, #tpu.memory_space<semaphore_mem>>) src(%108 : memref<1x16xf32, #tpu.memory_space<any>>) dst(%109 : memref<1x16xf32, #tpu.memory_space<vmem>>)
    %c0 = arith.constant 0 : index
    %c0_87 = arith.constant 0 : index
    %112 = vector.load %arg6[%c0, %c0_87] : memref<8x16xf32, #tpu.memory_space<vmem>>, vector<1x16xf32>
    %c1 = arith.constant 1 : index
    %c0_88 = arith.constant 0 : index
    %113 = vector.load %arg6[%c1, %c0_88] : memref<8x16xf32, #tpu.memory_space<vmem>>, vector<1x16xf32>
    %114 = arith.addf %112, %113 : vector<1x16xf32>
    %c2 = arith.constant 2 : index
    %c0_89 = arith.constant 0 : index
    %115 = vector.load %arg6[%c2, %c0_89] : memref<8x16xf32, #tpu.memory_space<vmem>>, vector<1x16xf32>
    %116 = arith.addf %114, %115 : vector<1x16xf32>
    %c3 = arith.constant 3 : index
    %c0_90 = arith.constant 0 : index
    %117 = vector.load %arg6[%c3, %c0_90] : memref<8x16xf32, #tpu.memory_space<vmem>>, vector<1x16xf32>
    %118 = arith.addf %116, %117 : vector<1x16xf32>
    %c4 = arith.constant 4 : index
    %c0_91 = arith.constant 0 : index
    %119 = vector.load %arg6[%c4, %c0_91] : memref<8x16xf32, #tpu.memory_space<vmem>>, vector<1x16xf32>
    %120 = arith.addf %118, %119 : vector<1x16xf32>
    %c5 = arith.constant 5 : index
    %c0_92 = arith.constant 0 : index
    %121 = vector.load %arg6[%c5, %c0_92] : memref<8x16xf32, #tpu.memory_space<vmem>>, vector<1x16xf32>
    %122 = arith.addf %120, %121 : vector<1x16xf32>
    %c6 = arith.constant 6 : index
    %c0_93 = arith.constant 0 : index
    %123 = vector.load %arg6[%c6, %c0_93] : memref<8x16xf32, #tpu.memory_space<vmem>>, vector<1x16xf32>
    %124 = arith.addf %122, %123 : vector<1x16xf32>
    %c7 = arith.constant 7 : index
    %c0_94 = arith.constant 0 : index
    %125 = vector.load %arg6[%c7, %c0_94] : memref<8x16xf32, #tpu.memory_space<vmem>>, vector<1x16xf32>
    %126 = arith.addf %124, %125 : vector<1x16xf32>
    %cst = arith.constant 1.250000e-01 : f32
    %127 = vector.broadcast %cst : f32 to vector<1x16xf32>
    %128 = arith.mulf %126, %127 : vector<1x16xf32>
    %c0_95 = arith.constant 0 : index
    %c0_96 = arith.constant 0 : index
    %129 = vector.load %arg3[%c0_95, %c0_96] : memref<16x128xf32, #tpu.memory_space<vmem>>, vector<16x128xf32>
    %cst_97 = arith.constant dense<0.000000e+00> : vector<1x128xf32>
    %130 = tpu.matmul %128, %129, %cst_97 {dimension_numbers = #tpu.dot_dimension_numbers<[1], [0], [0], [1], [0, 0, 1, 1], [], []>} : vector<1x16xf32>, vector<16x128xf32>, vector<1x128xf32> -> vector<1x128xf32>
    %c0_98 = arith.constant 0 : index
    %c0_99 = arith.constant 0 : index
    %131 = vector.load %arg4[%c0_98, %c0_99] : memref<1x128xf32, #tpu.memory_space<vmem>>, vector<1x128xf32>
    %132 = arith.addf %130, %131 : vector<1x128xf32>
    %cst_100 = arith.constant dense<0xFF800000> : vector<1xf32>
    %133 = vector.multi_reduction <maximumf>, %132, %cst_100 [1] : vector<1x128xf32> to vector<1xf32>
    %134 = vector.shape_cast %133 : vector<1xf32> to vector<1x1xf32>
    %135 = vector.broadcast %134 : vector<1x1xf32> to vector<1x128xf32>
    %136 = arith.subf %132, %135 : vector<1x128xf32>
    %137 = math.exp %136 : vector<1x128xf32>
    %cst_101 = arith.constant dense<0.000000e+00> : vector<1xf32>
    %138 = vector.multi_reduction <add>, %137, %cst_101 [1] : vector<1x128xf32> to vector<1xf32>
    %139 = vector.shape_cast %138 : vector<1xf32> to vector<1x1xf32>
    %140 = tpu.reciprocal %139 : vector<1x1xf32> -> vector<1x1xf32>
    %141 = vector.broadcast %140 : vector<1x1xf32> to vector<1x128xf32>
    %142 = arith.mulf %137, %141 : vector<1x128xf32>
    %c0_102 = arith.constant 0 : index
    %c0_103 = arith.constant 0 : index
    %c0_104 = arith.constant 0 : index
    %143 = vector.load %arg5[%c0_102, %c0_103, %c0_104] : memref<1x1x128xf32, #tpu.memory_space<vmem>>, vector<1x1x128xf32>
    %144 = vector.shape_cast %143 : vector<1x1x128xf32> to vector<1x128xf32>
    %145 = vector.shape_cast %142 : vector<1x128xf32> to vector<1x1x128xf32>
    tpu.vector_store %arg5[%c0_102, %c0_103, %c0_104], %145 {strides = array<i32>} : memref<1x1x128xf32, #tpu.memory_space<vmem>>, vector<1x1x128xf32>,
    return
  }
  func.func @transform_1(%arg0: i32, %arg1: memref<16xi32, #tpu.memory_space<smem>>) -> (i32, i32) {
    %c0_i32 = arith.constant 0 : i32
    %c0_i32_0 = arith.constant 0 : i32
    %c0_i32_1 = arith.constant 0 : i32
    return %c0_i32, %c0_i32_0 : i32, i32
  }
  func.func @transform_2(%arg0: i32, %arg1: memref<16xi32, #tpu.memory_space<smem>>) -> (i32, i32) {
    %c0_i32 = arith.constant 0 : i32
    %c0_i32_0 = arith.constant 0 : i32
    %c0_i32_1 = arith.constant 0 : i32
    return %c0_i32, %c0_i32_0 : i32, i32
  }
  func.func @transform_3(%arg0: i32, %arg1: memref<16xi32, #tpu.memory_space<smem>>) -> (i32, i32, i32) {
    %c0_i32 = arith.constant 0 : i32
    %c0_i32_0 = arith.constant 0 : i32
    %c0_i32_1 = arith.constant 0 : i32
    return %arg0, %c0_i32, %c0_i32_0 : i32, i32, i32
  }
}

</mosaic_0001>

<bundles_post_ra>
// kernel: tpu_custom_call.1
= control target key start
LH: loop header
LB: loop body
LE: loop exit
PB: predicated region body
PF: predicated region fallthrough
CT: control target
= control target key end

     0   :  { %s1194_s0 = inlined_call_operand.vmem [shape: s32[16], index: 0, kind: input, shape index: {}]   ;;  %s1195_s1 = inlined_call_operand.vmem [shape: f32[1024,16], index: 1, kind: input, shape index: {}]   ;;  %s1196_s2 = inlined_call_operand.vmem [shape: f32[16,128], index: 2, kind: input, shape index: {}]   ;;  %s1197_s3 = inlined_call_operand.vmem [shape: f32[1,128], index: 3, kind: input, shape index: {}]   ;;  %s1198_s4 = inlined_call_operand.hbm [shape: f32[2,1,128], index: 4, kind: output, shape index: {}]  }
   0x1   :  { %s9_s17 = sshll.u32 %s1194_s0, 4  ;;  %s10_s17 = int_to_ptr.vmem [resolvable:$true] %s9_s17 }
   0x2   :  { %s936_s18 = scalar_lea.vmem %s10_s17, 16  ;;  %p941_p1 = scmp.lt.s32.totalorder %s10_s17, %s10_s17 }
   0x3   :  { %p937_p0 = scmp.ne.s32.totalorder %s10_s17, %s936_s18  ;;  %p942_p2 = scmp.lt.s32.totalorder %s936_s18, %s936_s18 }
   0x5   :  { %p943_p3 = por %p942_p2, %p941_p1 }
   0x7   :  { %p944_p4 = pnand %p943_p3, %p937_p0 }
   0x9   :  { %947 = shalt.err (!%p944_p4)  }
   0xa   :  { %s1028_s19 = smov [#allocation5]  }
   0xb   :  { %12 = dma.vmem_to_smem %s10_s17, 16, %s1028_s19, [#allocation4] }
   0xc   :  { %990 = dma.done.wait [#allocation4], 16 }
   0xd   :  { %991 = vsyncadd [#allocation4], 4294967280 }
   0xe   :  { %14 = sfence }
   0xf   :  { %15 = vsyncpa [#allocation7], 0 }
  0x10   :  { %17 = vsyncpa [#allocation7 + $0x1], 0  ;;  %s1060_s20 = smov 0   ;;  %s1062_s21 = smov 0  }
  0x11   :  { %s1064_s0 = smov 0   ;;  %s1066_s22 = smov 0  }
  0x12 LB: > { %s1081_s23 = sadd.s32 4294967295, %s1026_s22   ;;  %s864_s24 = sadd.s32 4294967294, %s1026_s22   ;;  %s1026_s22 = sphi %s1066_s22, %s1204_s22   ;;  %s1022_s0 = sphi %s1064_s0, %s1203_s0   ;;  %s1018_s21 = sphi %s1062_s21, %s1202_s21   ;;  %s1014_s20 = sphi %s1060_s20, %s1201_s20  }
  0x13   : > { %s1085_s25 = sadd.s32 1, %s1026_s22   ;;  %s72_s26 = sadd.s32 1, %s1022_s0 }
  0x14   : > { %s69_s27 = ssub.s32 %s1026_s22, %s1085_s25  ;;  %p82_p5 = scmp.ne.s32.totalorder %s1022_s0, %s1018_s21 }
  0x15   : > { %p70_p6 = scmp.eq.s32.totalorder %s69_s27, 0  ;;  %p83_p7 = scmp.eq.s32.totalorder %s1081_s23, 1 }
  0x16   : > { %p88_p8 = scmp.ne.s32.totalorder %s1018_s21, %s1014_s20  ;;  %p89_p9 = scmp.eq.s32.totalorder %s864_s24, 1 }
  0x17   : > { %s1096_s28 = scalar_select %p70_p6, %s1022_s0, %s72_s26  }
  0x18   : > { %p1098_p10 = por %p83_p7, %p82_p5  ;;  %p1102_p11 = por %p89_p9, %p88_p8 }
  0x19   : > { %p866_p12 = scmp.ge.s32.totalorder %s1026_s22, 1  ;;  %p113_p13 = scmp.lt.s32.totalorder %s1026_s22, 3 }
  0x1b   : > { %p114_p0 = pnand %p866_p12, %p113_p13 }
  0x1c   : > { %s127_s5 = sand.u32 (!%p114_p0), 1, %s1018_s21   ;;  %s1110_s6 = sshll.u32 (!%p114_p0), %s1081_s23, 3 }
  0x1d   : > { %117 = sbr.rel (%p114_p0) target bundleno = 662 (0x296), region = 28  ;;  %s130_s7 = sld [smem:[#allocation5 + %s1110_s6]] (!%p114_p0) }
  0x1e   : > { %s1118_s11 = scalar_lea.vmem (!%p114_p0), [#allocation6], %s127_s5 }
  0x23   : > { %s131_s10 = scalar_lea.vmem %s1195_s1, %s130_s7 }
  0x24   : > { %v150_v0 = vld [vmem:[%s131_s10] sm:$0x1] }
  0x25   : > { %151 = vst [vmem:[#allocation2] sm:$0x1] %v150_v0 }
  0x26   : > { %177 = vsyncadd [#allocation3], 16  ;;  %s178_s12 = sadd.s32 1, %s1110_s6 }
  0x27   : > { %s179_s13 = sld [smem:[#allocation5 + %s178_s12]] }
  0x2d   : > { %s180_s16 = scalar_lea.vmem %s1195_s1, %s179_s13 }
  0x2e   : > { %v201_v1 = vld [vmem:[%s180_s16] sm:$0x1] }
  0x2f   : > { %202 = vst [vmem:[#allocation2 + $0x1] sm:$0x1] %v201_v1 }
  0x30   : > { %228 = vsyncadd [#allocation3 + $0x1], 16  ;;  %s229_s17 = sadd.s32 2, %s1110_s6 }
  0x31   : > { %s230_s18 = sld [smem:[#allocation5 + %s229_s17]] }
  0x37   : > { %s231_s26 = scalar_lea.vmem %s1195_s1, %s230_s18 }
  0x38   : > { %v252_v2 = vld [vmem:[%s231_s26] sm:$0x1] }
  0x39   : > { %253 = vst [vmem:[#allocation2 + $0x2] sm:$0x1] %v252_v2 }
  0x3a   : > { %279 = vsyncadd [#allocation3 + $0x2], 16  ;;  %s280_s27 = sadd.s32 3, %s1110_s6 }
  0x3b   : > { %s281_s7 = sld [smem:[#allocation5 + %s280_s27]] }
  0x41   : > { %s282_s10 = scalar_lea.vmem %s1195_s1, %s281_s7 }
  0x42   : > { %v303_v3 = vld [vmem:[%s282_s10] sm:$0x1] }
  0x43   : > { %304 = vst [vmem:[#allocation2 + $0x3] sm:$0x1] %v303_v3 }
  0x44   : > { %330 = vsyncadd [#allocation3 + $0x3], 16  ;;  %s331_s12 = sadd.s32 4, %s1110_s6 }
  0x45   : > { %s332_s13 = sld [smem:[#allocation5 + %s331_s12]] }
  0x4b   : > { %s333_s16 = scalar_lea.vmem %s1195_s1, %s332_s13 }
  0x4c   : > { %v354_v4 = vld [vmem:[%s333_s16] sm:$0x1] }
  0x4d   : > { %355 = vst [vmem:[#allocation2 + $0x4] sm:$0x1] %v354_v4 }
  0x4e   : > { %381 = vsyncadd [#allocation3 + $0x4], 16  ;;  %s382_s17 = sadd.s32 5, %s1110_s6 }
  0x4f   : > { %s383_s18 = sld [smem:[#allocation5 + %s382_s17]] }
  0x55   : > { %s384_s26 = scalar_lea.vmem %s1195_s1, %s383_s18 }
  0x56   : > { %v405_v5 = vld [vmem:[%s384_s26] sm:$0x1] }
  0x57   : > { %406 = vst [vmem:[#allocation2 + $0x5] sm:$0x1] %v405_v5 }
  0x58   : > { %432 = vsyncadd [#allocation3 + $0x5], 16  ;;  %s433_s27 = sadd.s32 6, %s1110_s6 }
  0x59   : > { %s434_s7 = sld [smem:[#allocation5 + %s433_s27]] }
  0x5f   : > { %s435_s10 = scalar_lea.vmem %s1195_s1, %s434_s7 }
  0x60   : > { %v456_v6 = vld [vmem:[%s435_s10] sm:$0x1] }
  0x61   : > { %457 = vst [vmem:[#allocation2 + $0x6] sm:$0x1] %v456_v6 }
  0x62   : > { %483 = vsyncadd [#allocation3 + $0x6], 16  ;;  %s484_s12 = sadd.s32 7, %s1110_s6 }
  0x63   : > { %s485_s13 = sld [smem:[#allocation5 + %s484_s12]] }
  0x69   : > { %s486_s16 = scalar_lea.vmem %s1195_s1, %s485_s13 }
  0x6a   : > { %v507_v7 = vld [vmem:[%s486_s16] sm:$0x1] }
  0x6b   : > { %508 = vst [vmem:[#allocation2 + $0x7] sm:$0x1] %v507_v7 }
  0x6c   : > { %534 = vsyncadd [#allocation3 + $0x7], 16 }
  0x6d   : > { %992 = dma.done.wait [#allocation3], 16 }
  0x6e   : > { %993 = vsyncadd [#allocation3], 4294967280 }
  0x6f   : > { %994 = dma.done.wait [#allocation3 + $0x1], 16 }
  0x70   : > { %995 = vsyncadd [#allocation3 + $0x1], 4294967280 }
  0x71   : > { %996 = dma.done.wait [#allocation3 + $0x2], 16 }
  0x72   : > { %997 = vsyncadd [#allocation3 + $0x2], 4294967280 }
  0x73   : > { %998 = dma.done.wait [#allocation3 + $0x3], 16 }
  0x74   : > { %999 = vsyncadd [#allocation3 + $0x3], 4294967280 }
  0x75   : > { %1000 = dma.done.wait [#allocation3 + $0x4], 16 }
  0x76   : > { %1001 = vsyncadd [#allocation3 + $0x4], 4294967280 }
  0x77   : > { %1002 = dma.done.wait [#allocation3 + $0x5], 16 }
  0x78   : > { %1003 = vsyncadd [#allocation3 + $0x5], 4294967280 }
  0x79   : > { %1004 = dma.done.wait [#allocation3 + $0x6], 16 }
  0x7a   : > { %1005 = vsyncadd [#allocation3 + $0x6], 4294967280 }
  0x7b   : > { %1006 = dma.done.wait [#allocation3 + $0x7], 16 }
  0x7c   : > { %1007 = vsyncadd [#allocation3 + $0x7], 4294967280  ;;  %v1029_v8 = vmov 0.0   ;;  %vm1030_vm0 = vmmov 0   ;;  %v569_v9 = vld [vmem:[%s1196_s2 + $0x8] sm:$0xff]  ;;  %v568_v10 = vld [vmem:[%s1196_s2] sm:$0xff] }
  0x7d   : > { %883 = vmatprep.subr.mxu0 %v1029_v8  ;;  %887 = vmatprep.mubr.msk.f32.mxu0 %vm1030_vm0, %v1029_v8  ;;  %v552_v11 = vld [vmem:[#allocation2] sm:$0x1]  ;;  %v553_v12 = vld [vmem:[#allocation2 + $0x1] sm:$0x1]  ;;  %v555_v13 = vld [vmem:[#allocation2 + $0x2] sm:$0x1] }
  0x7e   : > { %884 = vmatpush3.msra.mxu0 %v569_v9  ;;  %v554_v14 = vadd.f32 %v553_v12, %v552_v11  ;;  %v557_v15 = vld [vmem:[#allocation2 + $0x3] sm:$0x1]  ;;  %v559_v17 = vld [vmem:[#allocation2 + $0x4] sm:$0x1]  ;;  %v561_v19 = vld [vmem:[#allocation2 + $0x5] sm:$0x1] }
  0x7f   : > { %885 = vmatprep.subr.mxu0 %v1029_v8  ;;  %v563_v21 = vld [vmem:[#allocation2 + $0x6] sm:$0x1]  ;;  %v565_v23 = vld [vmem:[#allocation2 + $0x7] sm:$0x1]  ;;  %vm571_vm1 = vcmask 130048   ;;  %vm645_vm2 = vcmask 1040384  }
  0x80   : > { %886 = vmatpush3.msra.mxu0 %v568_v10  ;;  %v556_v16 = vadd.f32 %v555_v13, %v554_v14  ;;  %v570_v27 = vld [vmem:[%s1197_s3] sm:$0x1]  ;;  %s869_s27 = sshll.u32 %s1081_s23, 4  ;;  %s671_s7 = sshll.u32 %s1118_s11, 4  ;;  %s672_s7 = int_to_ptr.vmem [resolvable:$true] %s671_s7 }
  0x81   : > { %s669_s10 = scalar_lea.hbm %s1198_s4, %s869_s27  ;;  %s659_s12 = scalar_lea.sflag [#allocation7], %s127_s5 }
  0x82   : > { %v558_v18 = vadd.f32 %v557_v15, %v556_v16  ;;  %s948_s13 = scalar_lea.vmem %s672_s7, 16  ;;  %s1031_s14 = smov [#allocation6]  }
  0x83   : > { %p949_p1 = scmp.ne.s32.totalorder %s672_s7, %s948_s13  ;;  %s952_s15 = sshll.u32 %s1031_s14, 4  ;;  %s953_s15 = int_to_ptr.vmem [resolvable:$false] %s952_s15 }
  0x84   : > { %v560_v20 = vadd.f32 %v559_v17, %v558_v18  ;;  %s954_s23 = scalar_lea.vmem %s953_s15, 32  ;;  %p955_p4 = scmp.lt.s32.totalorder %s672_s7, %s953_s15 }
  0x85   : > { %p950_p2 = pnand %p949_p1, %p1098_p10  ;;  %p956_p5 = scmp.lt.s32.totalorder %s954_s23, %s948_s13 }
  0x86   : > { %v562_v22 = vadd.f32 %v561_v19, %v560_v20 }
  0x87   : > { %p951_p3 = pneg %p950_p2  ;;  %p957_p6 = por %p956_p5, %p955_p4 }
  0x88   : > { %v564_v24 = vadd.f32 %v563_v21, %v562_v22 }
  0x89   : > { %p958_p7 = pnand %p957_p6, %p951_p3 }
  0x8a   : > { %v566_v25 = vadd.f32 %v565_v23, %v564_v24 }
  0x8c   : > { %v567_v26 = vmul.f32 0.125, %v566_v25 }
  0x8e   : > { %888 = vmatmul.mubr.msk.f32.vlgmr.msra.gmra.mxu0 %vm571_vm1, %v567_v26 }
 0x14e   : > { %v641_v28 = vpop.f32.mrf.mxu0 }
 0x14f   : > { %v642_v29 = vadd.f32 %v641_v28, %v570_v27 }
 0x150   : > { %v889_v30 = vpop.f32.mrf.mxu0 }
 0x151   : > { %v646_v31 = vsel %vm645_vm2, %v642_v29, -inf }
 0x152   : > { %647 = vmax.xlane.f32.xlu0 %v646_v31 }
 0x1db   : > { %v648_v32 = vpop.xlane.xlu0 %647 }
 0x1dc   : > { %v649_v33 = vsub.f32 %v642_v29, %v648_v32 }
 0x1de   : > { %v650_v34 = vmul.f32 1.442695, %v649_v33 }
 0x1e0   : > { %932 = vpow2.f32 %v650_v34 }
 0x1ed   : > { %v933_v35 = vpop.eup %932 }
 0x1ee   : > { %v652_v36 = vsel %vm645_vm2, %v933_v35, 0.0 }
 0x1ef   : > { %653 = vadd.xlane.f32.xlu0 %v652_v36 }
 0x278   : > { %v654_v37 = vpop.xlane.xlu0 %653 }
 0x279   : > { %934 = vrcp.f32 %v654_v37 }
 0x286   : > { %v935_v38 = vpop.eup %934 }
 0x287   : > { %v656_v39 = vmul.f32 %v935_v38, %v933_v35 }
 0x289   : > { %657 = vst [vmem:[%s1118_s11] sm:$0x1] %v656_v39 }
 0x28a   : > { %961 = shalt.err (!%p958_p7)
}
 0x28b   : > { %s962_s16 = scalar_lea.hbm %s669_s10, 16  ;;  %s966_s6 = scalar_lea.hbm %s1198_s4, 32 }
 0x28c   : > { %p963_p8 = scmp.ne.s32.totalorder %s669_s10, %s962_s16  ;;  %p967_p13 = scmp.lt.s32.totalorder %s669_s10, %s1198_s4 }
 0x28d   : > { %p968_p0 = scmp.lt.s32.totalorder %s966_s6, %s962_s16 }
 0x28e   : > { %p964_p9 = pnand %p963_p8, %p1098_p10 }
 0x28f   : > { %p969_p1 = por %p968_p0, %p967_p13 }
 0x290   : > { %p965_p12 = pneg %p964_p9 }
 0x292   : > { %p970_p2 = pnand %p969_p1, %p965_p12 }
 0x294   : > { %973 = shalt.err (!%p970_p2)
}
 0x295   : > { %890 = dma.vmem_to_hbm [thread:$0]  (%p1098_p10), %s672_s7, 16, %s669_s10, %s659_s12  }
 0x296 PF: > { %p896_p3 = scmp.ge.s32.totalorder %s1026_s22, 2  ;;  %s683_s19 = sand.u32 1, %s1014_s20  }
 0x297   : > { %s684_s24 = scalar_lea.sflag [#allocation7], %s683_s19 }
 0x298   : > { %p893_p4 = pnand %p896_p3, %p1102_p11 }
 0x29a   : > { %p894_p5 = pneg %p893_p4 }
 0x29c   : > { %1009 = dma.done.wait (%p894_p5), %s684_s24, 16  }
 0x29d   : > { %1011 = vsyncadd (%p894_p5), %s684_s24, 4294967280  ;;  %p20_p6 = scmp.ge.s32.totalorder %s1085_s25, 4   ;;  %s1201_s20 = smov %s1018_s21 }
 0x29e   : > { %s1202_s21 = smov %s1022_s0  ;;  %s1203_s0 = smov %s1096_s28 }
 0x29f   : > { %s1204_s22 = smov %s1085_s25  ;;  %22 = sbr.rel (!%p20_p6) target bundleno = 18 (0x12), region = 409 }
 0x2a4   :  { %688 = vsyncpa [#allocation7], 1 }
 0x2a5   :  { %690 = vsyncpa [#allocation7 + $0x1], 1 }
 0x2a6   :  { %691 = vsyncmov [#allocation3] }
 0x2a9   :  { %s692_s22 = vpop.sfrf %691 }
 0x2aa   :  { %p872_p10 = scmp.ne.s32.totalorder %s692_s22, 0 }
 0x2ac   :  { %696 = shalt.err (%p872_p10)  }
 0x2ad   :  { %698 = vsyncmov [#allocation3 + $0x1] }
 0x2b0   :  { %s699_s29 = vpop.sfrf %698 }
 0x2b1   :  { %p873_p11 = scmp.ne.s32.totalorder %s699_s29, 0 }
 0x2b3   :  { %703 = shalt.err (%p873_p11)  }
 0x2b4   :  { %705 = vsyncmov [#allocation3 + $0x2] }
 0x2b7   :  { %s706_s30 = vpop.sfrf %705 }
 0x2b8   :  { %p874_p7 = scmp.ne.s32.totalorder %s706_s30, 0 }
 0x2ba   :  { %710 = shalt.err (%p874_p7)  }
 0x2bb   :  { %712 = vsyncmov [#allocation3 + $0x3] }
 0x2be   :  { %s713_s26 = vpop.sfrf %712 }
 0x2bf   :  { %p875_p8 = scmp.ne.s32.totalorder %s713_s26, 0 }
 0x2c1   :  { %717 = shalt.err (%p875_p8)  }
 0x2c2   :  { %719 = vsyncmov [#allocation3 + $0x4] }
 0x2c5   :  { %s720_s25 = vpop.sfrf %719 }
 0x2c6   :  { %p876_p9 = scmp.ne.s32.totalorder %s720_s25, 0 }
 0x2c8   :  { %724 = shalt.err (%p876_p9)  }
 0x2c9   :  { %726 = vsyncmov [#allocation3 + $0x5] }
 0x2cc   :  { %s727_s1 = vpop.sfrf %726 }
 0x2cd   :  { %p877_p12 = scmp.ne.s32.totalorder %s727_s1, 0 }
 0x2cf   :  { %731 = shalt.err (%p877_p12)  }
 0x2d0   :  { %733 = vsyncmov [#allocation3 + $0x6] }
 0x2d3   :  { %s734_s2 = vpop.sfrf %733 }
 0x2d4   :  { %p878_p13 = scmp.ne.s32.totalorder %s734_s2, 0 }
 0x2d6   :  { %738 = shalt.err (%p878_p13)  }
 0x2d7   :  { %740 = vsyncmov [#allocation3 + $0x7] }
 0x2da   :  { %s741_s3 = vpop.sfrf %740 }
 0x2db   :  { %p879_p0 = scmp.ne.s32.totalorder %s741_s3, 0 }
 0x2dd   :  { %745 = shalt.err (%p879_p0)  }

</bundles_post_ra>
